<compile_context>
chip_gen: v5e
topology: v5e:2x2
jax: 0.10.0
libtpu: 0.0.40
codegen_flags: <defaults>
</compile_context>

<pallas_src>
from functools import partial

import jax
import jax.numpy as jnp
from jax.experimental import pallas as pl
from jax.experimental.pallas import tpu as pltpu


def _round_up(n: int, m: int) -> int:
    return ((n + m - 1) // m) * m


def _cheby_kan_kernel(x_ref, w_ref, o_ref, *, degree: int, matmul_dtype):
    # x_ref: (tile_n, in_p)                 activations (one row tile)
    # w_ref: ((degree+1)*in_p, tile_o)      fused Chebyshev coefficient slab
    # o_ref: (tile_n, tile_o)
    x = jnp.tanh(x_ref[...].astype(jnp.float32))

    # Chebyshev recurrence in f32; each T_d is cast to the matmul dtype as it
    # is produced so the concatenated slab is narrow from the start.
    ts = [jnp.ones_like(x).astype(matmul_dtype)]
    if degree >= 1:
        ts.append(x.astype(matmul_dtype))
        two_x = x + x                       # hoisted out of the loop
        t_prev, t_cur = jnp.ones_like(x), x
        for _ in range(degree - 1):
            t_next = two_x * t_cur - t_prev
            t_prev, t_cur = t_cur, t_next
            ts.append(t_cur.astype(matmul_dtype))

    # Column layout: [T_0(all i) | T_1(all i) | ... | T_D(all i)].  in_p is a
    # multiple of 128, so every concat boundary is lane-aligned.
    t_cat = jnp.concatenate(ts, axis=-1)

    o_ref[...] = jnp.dot(
        t_cat, w_ref[...], preferred_element_type=jnp.float32
    ).astype(o_ref.dtype)


def cheby_kan_layer(x, cheby_coeffs, *, degree: int,
                    tile_n: int | None = None, tile_o: int | None = None,
                    matmul_dtype=jnp.bfloat16):
    """ChebyKAN forward.

    x:            (batch, seq, input_dim)
    cheby_coeffs: (input_dim, output_dim, degree + 1)
    returns       (batch, seq, output_dim)

    Note: default matmul_dtype=bfloat16 uses bf16 MXU operands with f32
    accumulation (≈1e-3 relative error vs the f32 PyTorch reference).
    """
    batch, seq, input_dim = x.shape
    assert cheby_coeffs.shape[0] == input_dim
    assert cheby_coeffs.shape[2] == degree + 1
    output_dim = cheby_coeffs.shape[1]

    n_rows = batch * seq
    n_rows_8 = _round_up(n_rows, 8)

    in_p = _round_up(input_dim, 128)          # lane-aligned concat boundaries
    out_p_min = _round_up(output_dim, 128)    # lane-dense output
    k_dim = (degree + 1) * in_p

    mm_bytes = jnp.dtype(matmul_dtype).itemsize
    xb = jnp.dtype(x.dtype).itemsize
    ob = xb

    def footprint(tn, to):
        return (2 * tn * in_p * xb            # x blocks (double-buffered)
                + 2 * k_dim * to * mm_bytes   # W blocks (double-buffered)
                + 2 * tn * to * ob            # out blocks (double-buffered)
                + tn * k_dim * mm_bytes       # fused T slab
                + 4 * tn * in_p * 4)          # f32 recurrence temps (headroom)

    budget = 36 << 20   # fits v7x 64 MiB physical VMEM with headroom
    sel_n = sel_o = None
    # Path 1: full-W residency -> 1-D grid, W is DMA'd exactly once.
    for tn in (1024, 512, 256, 128):
        tn = min(tn, n_rows_8)
        if footprint(tn, out_p_min) <= budget:
            sel_n, sel_o = tn, out_p_min
            break
    if sel_n is None:
        # Path 2: 2-D grid with output tiles on the OUTER axis, so the W block
        # index is constant along the inner (row) axis (no W re-streaming per
        # row tile); only x is re-streamed grid_j times.
        for tn in (512, 256, 128):
            tn = min(tn, n_rows_8)
            for to in (1024, 512, 256, 128):
                to = min(to, out_p_min)
                if footprint(tn, to) <= budget:
                    sel_n, sel_o = tn, to
                    break
            if sel_n is not None:
                break
    if sel_n is None:
        sel_n, sel_o = min(128, n_rows_8), 128
    if tile_n is not None:
        sel_n = min(tile_n, n_rows_8)
    if tile_o is not None:
        sel_o = tile_o
    tile_n, tile_o = sel_n, sel_o
    assert tile_n % 8 == 0 and tile_o % 128 == 0

    n_rows_p = _round_up(n_rows, tile_n)
    out_p = _round_up(output_dim, tile_o)

    # Pad activations: rows to tile_n, input columns to in_p (zeros).
    x_flat = x.reshape(n_rows, input_dim)
    pad_r, pad_c = n_rows_p - n_rows, in_p - input_dim
    if pad_r or pad_c:
        x_flat = jnp.pad(x_flat, ((0, pad_r), (0, pad_c)))

    # Coeffs (I, O, D+1) -> zero-pad I -> (D+1, in_p, O) -> (K, O).
    # Padded input columns contribute nothing because their W rows are zero.
    coeffs_p = cheby_coeffs
    if pad_c:
        coeffs_p = jnp.pad(coeffs_p, ((0, pad_c), (0, 0), (0, 0)))
    w = jnp.transpose(coeffs_p, (2, 0, 1)).reshape(k_dim, output_dim)
    if out_p != output_dim:
        w = jnp.pad(w, ((0, 0), (0, out_p - output_dim)))
    w = w.astype(matmul_dtype)

    kernel = partial(_cheby_kan_kernel, degree=degree, matmul_dtype=matmul_dtype)

    grid_i = n_rows_p // tile_n
    grid_j = out_p // tile_o
    vmem_limit = 48 << 20    # explicit: v5e scoped default is only 16 MiB

    if grid_j == 1:
        grid = (grid_i,)
        in_specs = [
            pl.BlockSpec((tile_n, in_p), lambda i: (i, 0)),
            pl.BlockSpec((k_dim, tile_o), lambda i: (0, 0)),   # resident W
        ]
        out_specs = pl.BlockSpec((tile_n, tile_o), lambda i: (i, 0))
        dims = ("parallel",)
    else:
        grid = (grid_j, grid_i)                                # rows innermost
        in_specs = [
            pl.BlockSpec((tile_n, in_p), lambda j, i: (i, 0)),
            pl.BlockSpec((k_dim, tile_o), lambda j, i: (0, j)),  # const along i
        ]
        out_specs = pl.BlockSpec((tile_n, tile_o), lambda j, i: (i, j))
        dims = ("parallel", "parallel")

    y = pl.pallas_call(
        kernel,
        out_shape=jax.ShapeDtypeStruct((n_rows_p, out_p), x.dtype),
        grid_spec=pltpu.PrefetchScalarGridSpec(
            num_scalar_prefetch=0,
            grid=grid,
            in_specs=in_specs,
            out_specs=out_specs,
        ),
        compiler_params=pltpu.CompilerParams(
            dimension_semantics=dims,
            vmem_limit_bytes=vmem_limit),
    )(x_flat, w)

    return y[:n_rows, :output_dim].reshape(batch, seq, output_dim)


def _reference(x, cheby_coeffs, degree):
    """Pure-JAX f32 reference matching the PyTorch module exactly."""
    batch, seq, input_dim = x.shape
    xf = jnp.tanh(x.reshape(-1, input_dim).astype(jnp.float32))
    theta = jnp.arccos(xf)[..., None]                         # (N, I, 1)
    arange = jnp.arange(degree + 1, dtype=jnp.float32)        # (D+1,)
    T = jnp.cos(theta * arange)                               # (N, I, D+1)
    y = jnp.einsum('bid,iod->bo', T, cheby_coeffs.astype(jnp.float32))
    return y.reshape(batch, seq, -1).astype(x.dtype)


if __name__ == "__main__":
    batch, seq = 2, 8
    input_dim, output_dim, degree = 32, 32, 3

    key = jax.random.PRNGKey(0)
    k_x, k_c = jax.random.split(key)

    x = jax.random.normal(k_x, (batch, seq, input_dim), dtype=jnp.float32)

    # nn.init.normal_(mean=0, std=1/(input_dim*(degree+1)))
    std = 1.0 / (input_dim * (degree + 1))
    cheby_coeffs = std * jax.random.normal(
        k_c, (input_dim, output_dim, degree + 1), dtype=jnp.float32)

    y_ref = _reference(x, cheby_coeffs, degree)

    # Default path: bf16 MXU operands, f32 accumulation.
    y_bf16 = cheby_kan_layer(x, cheby_coeffs, degree=degree)
    y_bf16 = jax.block_until_ready(y_bf16)
    assert y_bf16.shape == (batch, seq, output_dim)
    assert jnp.allclose(y_bf16, y_ref, atol=2e-3, rtol=2e-2), \
        "bf16 kernel mismatch vs reference"

    # Full-precision path: tight tolerance check.
    y_f32 = cheby_kan_layer(x, cheby_coeffs, degree=degree,
                            matmul_dtype=jnp.float32)
    y_f32 = jax.block_until_ready(y_f32)
    assert jnp.allclose(y_f32, y_ref, atol=1e-5, rtol=1e-5), \
        "f32 kernel mismatch vs reference"

    print("KERNEL_OK")
</pallas_src>

<mosaic_0001>
module attributes {stable_mosaic.version = 11 : i64} {
  func.func @_cheby_kan_kernel(%arg0: i32, %arg1: memref<16x128xf32, #tpu.memory_space<vmem>>, %arg2: memref<512x128xbf16, #tpu.memory_space<vmem>>, %arg3: memref<16x128xf32, #tpu.memory_space<vmem>>) attributes {dimension_semantics = [#tpu.dimension_semantics<parallel>], iteration_bounds = array<i64: 1>, scalar_prefetch = 0 : i64, scratch_operands = 0 : i64, tpu.core_type = #tpu.core_type<tc>, window_params = [{transform_indices = @transform_0, window_bounds = array<i64: 16, 128>}, {pipeline_mode = #tpu.pipeline_mode<synchronous>, transform_indices = @transform_1, window_bounds = array<i64: 512, 128>}, {transform_indices = @transform_2, window_bounds = array<i64: 16, 128>}]} {
    %c0 = arith.constant 0 : index
    %c0_0 = arith.constant 0 : index
    %0 = vector.load %arg1[%c0, %c0_0] : memref<16x128xf32, #tpu.memory_space<vmem>>, vector<16x128xf32>
    %1 = math.tanh %0 : vector<16x128xf32>
    %cst = arith.constant 1.000000e+00 : f32
    %2 = vector.broadcast %cst : f32 to vector<16x128xf32>
    %3 = arith.truncf %2 : vector<16x128xf32> to vector<16x128xbf16>
    %4 = arith.truncf %1 : vector<16x128xf32> to vector<16x128xbf16>
    %5 = arith.addf %1, %1 : vector<16x128xf32>
    %cst_1 = arith.constant 1.000000e+00 : f32
    %6 = vector.broadcast %cst_1 : f32 to vector<16x128xf32>
    %7 = arith.mulf %5, %1 : vector<16x128xf32>
    %8 = arith.subf %7, %6 : vector<16x128xf32>
    %9 = arith.truncf %8 : vector<16x128xf32> to vector<16x128xbf16>
    %10 = arith.mulf %5, %8 : vector<16x128xf32>
    %11 = arith.subf %10, %1 : vector<16x128xf32>
    %12 = arith.truncf %11 : vector<16x128xf32> to vector<16x128xbf16>
    %13 = tpu.concatenate %3, %4, %9, %12 in 1 : vector<16x128xbf16>, vector<16x128xbf16>, vector<16x128xbf16>, vector<16x128xbf16> -> vector<16x512xbf16>
    %c0_2 = arith.constant 0 : index
    %c0_3 = arith.constant 0 : index
    %14 = vector.load %arg2[%c0_2, %c0_3] : memref<512x128xbf16, #tpu.memory_space<vmem>>, vector<512x128xbf16>
    %cst_4 = arith.constant dense<0.000000e+00> : vector<16x128xf32>
    %15 = tpu.matmul %13, %14, %cst_4 {dimension_numbers = #tpu.dot_dimension_numbers<[1], [0], [0], [1], [0, 0, 1, 1], [], []>} : vector<16x512xbf16>, vector<512x128xbf16>, vector<16x128xf32> -> vector<16x128xf32>
    %c0_5 = arith.constant 0 : index
    %c0_6 = arith.constant 0 : index
    %16 = vector.load %arg3[%c0_5, %c0_6] : memref<16x128xf32, #tpu.memory_space<vmem>>, vector<16x128xf32>
    tpu.vector_store %arg3[%c0_5, %c0_6], %15 {strides = array<i32>} : memref<16x128xf32, #tpu.memory_space<vmem>>, vector<16x128xf32>,
    return
  }
  func.func @transform_0(%arg0: i32) -> (i32, i32) {
    %c0_i32 = arith.constant 0 : i32
    %c0_i32_0 = arith.constant 0 : i32
    return %arg0, %c0_i32 : i32, i32
  }
  func.func @transform_1(%arg0: i32) -> (i32, i32) {
    %c0_i32 = arith.constant 0 : i32
    %c0_i32_0 = arith.constant 0 : i32
    %c0_i32_1 = arith.constant 0 : i32
    return %c0_i32, %c0_i32_0 : i32, i32
  }
  func.func @transform_2(%arg0: i32) -> (i32, i32) {
    %c0_i32 = arith.constant 0 : i32
    %c0_i32_0 = arith.constant 0 : i32
    return %arg0, %c0_i32 : i32, i32
  }
}

</mosaic_0001>

<bundles_post_ra>
// kernel: tpu_custom_call.1
= control target key start
LH: loop header
LB: loop body
LE: loop exit
PB: predicated region body
PF: predicated region fallthrough
CT: control target
= control target key end

     0   :  { %7 = vsyncpa [#allocation3], 0  ;;  %s707_s0 = inlined_call_operand.hbm [shape: f32[16,128], index: 0, kind: input, shape index: {}]   ;;  %s708_s1 = inlined_call_operand.hbm [shape: bf16[512,128], index: 1, kind: input, shape index: {}]   ;;  %s709_s2 = inlined_call_operand.hbm [shape: f32[16,128], index: 2, kind: output, shape index: {}]  }
   0x1   :  { %8 = vsyncpa [#allocation6], 0 }
   0x2   :  { %9 = vsyncpa [#allocation4], 0  ;;  %s14_s11 = sshll.u32 %s707_s0, 4  ;;  %s669_s12 = smov [#allocation2]   ;;  %s15_s11 = int_to_ptr.hbm [resolvable:$true] %s14_s11 }
   0x3   :  { %s16_s13 = sshll.u32 %s669_s12, 4  ;;  %s27_s16 = sshll.u32 %s708_s1, 4  ;;  %s17_s13 = int_to_ptr.vmem [resolvable:$true] %s16_s13  ;;  %s28_s16 = int_to_ptr.hbm [resolvable:$true] %s27_s16 }
   0x4   :  { %s670_s17 = smov 128   ;;  %s671_s18 = smov 8  }
   0x5   :  { %22 = dma.hbm_to_vmem [thread:$0]  %s15_s11, 256, %s17_s13, [#allocation3], %s670_s17, %s670_s17, %s671_s18  }
   0x6   :  { %s672_s19 = smov [#allocation5]   ;;  %s673_s21 = smov 64  }
   0x7   :  { %s29_s20 = sshll.u32 %s672_s19, 4  ;;  %s674_s0 = smov 4   ;;  %s30_s20 = int_to_ptr.vmem [resolvable:$true] %s29_s20 }
   0x8   :  { %35 = dma.hbm_to_vmem [thread:$0]  %s28_s16, 4096, %s30_s20, [#allocation6], %s673_s21, %s673_s21, %s674_s0  }
   0x9   :  { %663 = dma.done.wait [#allocation3], 256  }
   0xa   :  { %664 = vsyncadd [#allocation3], 4294967040 }
   0xb   :  { %665 = dma.done.wait [#allocation6], 4096  }
   0xc   :  { %666 = vsyncadd [#allocation6], 4294963200  ;;  %v554_v0 = vld [vmem:[#allocation5 + $0x38] sm:$0xff]  ;;  %v553_v4 = vld [vmem:[#allocation5 + $0x30] sm:$0xff]  ;;  %v675_v60 = vmov 1065369472  }
   0xd   :  { %v562_v1 = vld [vmem:[#allocation5 + $0x78] sm:$0xff]  ;;  %339 = vmatpush.bf16.msra.mxu0 %v554_v0  ;;  %v561_v5 = vld [vmem:[#allocation5 + $0x70] sm:$0xff]  ;;  %v552_v8 = vld [vmem:[#allocation5 + $0x28] sm:$0xff]  ;;  %s676_s1 = smov [#allocation7]   ;;  %s403_s25 = sshll.u32 %s709_s2, 4  ;;  %s404_s25 = int_to_ptr.hbm [resolvable:$true] %s403_s25 }
   0xe   :  { %v570_v2 = vld [vmem:[#allocation5 + $0xb8] sm:$0xff]  ;;  %353 = vmatpush.bf16.msra.mxu1 %v562_v1  ;;  %v569_v6 = vld [vmem:[#allocation5 + $0xb0] sm:$0xff]  ;;  %v560_v9 = vld [vmem:[#allocation5 + $0x68] sm:$0xff]  ;;  %s401_s22 = sshll.u32 %s676_s1, 4  ;;  %s402_s22 = int_to_ptr.vmem [resolvable:$true] %s401_s22 }
   0xf   :  { %v578_v3 = vld [vmem:[#allocation5 + $0xf8] sm:$0xff]  ;;  %367 = vmatpush.bf16.msra.mxu2 %v570_v2  ;;  %v577_v7 = vld [vmem:[#allocation5 + $0xf0] sm:$0xff]  ;;  %v568_v10 = vld [vmem:[#allocation5 + $0xa8] sm:$0xff] }
  0x10   :  { %381 = vmatpush.bf16.msra.mxu3 %v578_v3  ;;  %v576_v11 = vld [vmem:[#allocation5 + $0xe8] sm:$0xff]  ;;  %v551_v12 = vld [vmem:[#allocation5 + $0x20] sm:$0xff]  ;;  %v45_v14 = vld [vmem:[#allocation2] sm:$0xff] }
  0x11   :  { %340 = vmatpush.bf16.msra.mxu0 %v553_v4  ;;  %v559_v13 = vld [vmem:[#allocation5 + $0x60] sm:$0xff]  ;;  %v46_v17 = vld [vmem:[#allocation2 + $0x8] sm:$0xff]  ;;  %587 = vtanh.f32 %v45_v14  ;;  %v549_v24 = vld [vmem:[#allocation5 + $0x10] sm:$0xff] }
  0x12   :  { %354 = vmatpush.bf16.msra.mxu1 %v561_v5  ;;  %v567_v15 = vld [vmem:[#allocation5 + $0xa0] sm:$0xff]  ;;  %589 = vtanh.f32 %v46_v17  ;;  %v550_v18 = vld [vmem:[#allocation5 + $0x18] sm:$0xff]  ;;  %v557_v25 = vld [vmem:[#allocation5 + $0x50] sm:$0xff] }
  0x13   :  { %368 = vmatpush.bf16.msra.mxu2 %v569_v6  ;;  %v575_v16 = vld [vmem:[#allocation5 + $0xe0] sm:$0xff]  ;;  %v558_v19 = vld [vmem:[#allocation5 + $0x58] sm:$0xff]  ;;  %v565_v27 = vld [vmem:[#allocation5 + $0x90] sm:$0xff] }
  0x14   :  { %382 = vmatpush.bf16.msra.mxu3 %v577_v7  ;;  %v566_v20 = vld [vmem:[#allocation5 + $0x98] sm:$0xff]  ;;  %v573_v28 = vld [vmem:[#allocation5 + $0xd0] sm:$0xff]  ;;  %v548_v34 = vld [vmem:[#allocation5 + $0x8] sm:$0xff] }
  0x15   :  { %341 = vmatpush.bf16.msra.mxu0 %v552_v8  ;;  %v574_v21 = vld [vmem:[#allocation5 + $0xd8] sm:$0xff]  ;;  %v556_v35 = vld [vmem:[#allocation5 + $0x48] sm:$0xff]  ;;  %v547_v46 = vld [vmem:[#allocation5] sm:$0xff] }
  0x16   :  { %355 = vmatpush.bf16.msra.mxu1 %v560_v9  ;;  %v564_v37 = vld [vmem:[#allocation5 + $0x88] sm:$0xff]  ;;  %v555_v47 = vld [vmem:[#allocation5 + $0x40] sm:$0xff] }
  0x17   :  { %369 = vmatpush.bf16.msra.mxu2 %v568_v10  ;;  %v588_v22 = vpop.eup %587  ;;  %v572_v38 = vld [vmem:[#allocation5 + $0xc8] sm:$0xff]  ;;  %v563_v50 = vld [vmem:[#allocation5 + $0x80] sm:$0xff] }
  0x18   :  { %383 = vmatpush.bf16.msra.mxu3 %v576_v11  ;;  %v590_v23 = vpop.eup %589  ;;  %v51_v26 = vadd.f32 %v588_v22, %v588_v22  ;;  %v49_v31 = vpack.c.bf16 %v588_v22, %v588_v22  ;;  %v571_v51 = vld [vmem:[#allocation5 + $0xc0] sm:$0xff] }
  0x19   :  { %342 = vmatpush.bf16.msra.mxu0 %v551_v12  ;;  %v52_v29 = vadd.f32 %v590_v23, %v590_v23  ;;  %v50_v32 = vpack.c.bf16 %v590_v23, %v590_v23 }
  0x1a   :  { %356 = vmatpush.bf16.msra.mxu1 %v559_v13  ;;  %v53_v30 = vmul.f32 %v588_v22, %v51_v26  ;;  %v67_v42 = vunpack.c.l.b16 %v49_v31 }
  0x1b   :  { %370 = vmatpush.bf16.msra.mxu2 %v567_v15  ;;  %v54_v33 = vmul.f32 %v590_v23, %v52_v29  ;;  %v68_v43 = vunpack.c.l.b16 %v50_v32 }
  0x1c   :  { %384 = vmatpush.bf16.msra.mxu3 %v575_v16  ;;  %v417_v36 = vadd.f32 -1.0, %v53_v30 }
  0x1d   :  { %343 = vmatpush.bf16.msra.mxu0 %v550_v18  ;;  %v418_v39 = vadd.f32 -1.0, %v54_v33  ;;  %v69_v55 = vpack.c.b16 %v68_v43, %v67_v42 }
  0x1e   :  { %357 = vmatpush.bf16.msra.mxu1 %v558_v19  ;;  %v57_v40 = vpack.c.bf16 %v417_v36, %v417_v36  ;;  %v59_v41 = vmul.f32 %v417_v36, %v51_v26 }
  0x1f   :  { %371 = vmatpush.bf16.msra.mxu2 %v566_v20  ;;  %v58_v44 = vpack.c.bf16 %v418_v39, %v418_v39  ;;  %v60_v45 = vmul.f32 %v418_v39, %v52_v29 }
  0x20   :  { %385 = vmatpush.bf16.msra.mxu3 %v574_v21  ;;  %v73_v48 = vunpack.c.l.b16 %v57_v40  ;;  %v61_v49 = vsub.f32 %v59_v41, %v588_v22 }
  0x21   :  { %344 = vmatpush.bf16.msra.mxu0 %v549_v24  ;;  %v74_v52 = vunpack.c.l.b16 %v58_v44  ;;  %v62_v53 = vsub.f32 %v60_v45, %v590_v23 }
  0x22   :  { %358 = vmatpush.bf16.msra.mxu1 %v557_v25  ;;  %v63_v54 = vpack.c.bf16 %v61_v49, %v61_v49 }
  0x23   :  { %372 = vmatpush.bf16.msra.mxu2 %v565_v27  ;;  %v64_v56 = vpack.c.bf16 %v62_v53, %v62_v53  ;;  %v75_v57 = vpack.c.b16 %v74_v52, %v73_v48 }
  0x24   :  { %386 = vmatpush.bf16.msra.mxu3 %v573_v28  ;;  %v79_v58 = vunpack.c.l.b16 %v63_v54 }
  0x25   :  { %345 = vmatpush.bf16.msra.mxu0 %v548_v34  ;;  %v80_v59 = vunpack.c.l.b16 %v64_v56 }
  0x26   :  { %359 = vmatpush.bf16.msra.mxu1 %v556_v35 }
  0x27   :  { %373 = vmatpush.bf16.msra.mxu2 %v564_v37  ;;  %v81_v61 = vpack.c.b16 %v80_v59, %v79_v58 }
  0x28   :  { %387 = vmatpush.bf16.msra.mxu3 %v572_v38 }
  0x29   :  { %346 = vmatpush.bf16.msra.mxu0 %v547_v46 }
  0x2a   :  { %360 = vmatpush.bf16.msra.mxu1 %v555_v47 }
  0x2b   :  { %374 = vmatpush.bf16.msra.mxu2 %v563_v50 }
  0x2c   :  { %388 = vmatpush.bf16.msra.mxu3 %v571_v51  ;;  %347 = vmatmul.bf16.vlgmr.msra.gmra.mxu0 %v675_v60 }
  0x2d   :  { %361 = vmatmul.bf16.vlgmr.msra.gmra.mxu1 %v69_v55 }
  0x2e   :  { %375 = vmatmul.bf16.vlgmr.msra.gmra.mxu2 %v75_v57 }
  0x2f   :  { %389 = vmatmul.bf16.vlgmr.msra.gmra.mxu3 %v81_v61 }
  0xa9   :  { %v348_v62 = vpop.f32.mrf.mxu0 }
  0xaa   :  { %v362_v63 = vpop.f32.mrf.mxu1 }
  0xab   :  { %v363_v0 = vadd.f32 %v362_v63, %v348_v62 }
  0xb1   :  { %v376_v1 = vpop.f32.mrf.mxu2  ;;  %v350_v5 = vpop.f32.mrf.mxu0 }
  0xb2   :  { %v377_v2 = vadd.f32 %v376_v1, %v363_v0  ;;  %v390_v3 = vpop.f32.mrf.mxu3  ;;  %v364_v6 = vpop.f32.mrf.mxu1 }
  0xb3   :  { %v365_v7 = vadd.f32 %v364_v6, %v350_v5 }
  0xb4   :  { %v391_v4 = vadd.f32 %v390_v3, %v377_v2 }
  0xb6   :  { %395 = vst [vmem:[#allocation7] sm:$0xff] %v391_v4 }
  0xb9   :  { %v378_v8 = vpop.f32.mrf.mxu2 }
  0xba   :  { %v379_v9 = vadd.f32 %v378_v8, %v365_v7  ;;  %v392_v10 = vpop.f32.mrf.mxu3 }
  0xbc   :  { %v393_v11 = vadd.f32 %v392_v10, %v379_v9 }
  0xbe   :  { %396 = vst [vmem:[#allocation7 + $0x8] sm:$0xff] %v393_v11 }
  0xbf   :  { %409 = dma.vmem_to_hbm [thread:$0]  %s402_s22, 256, %s404_s25, [#allocation4], %s670_s17, %s670_s17, %s671_s18  }
  0xc0   :  { %667 = dma.done.wait [#allocation4], 256  }
  0xc1   :  { %668 = vsyncadd [#allocation4], 4294967040 }
  0xc2   :  { %414 = vsyncpa [#allocation3], 1 }
  0xc3   :  { %415 = vsyncpa [#allocation6], 1 }
  0xc4   :  { %416 = vsyncpa [#allocation4], 1 }

</bundles_post_ra>
